<compile_context>
chip_gen: v7x
topology: tpu7x:2x2x1
jax: 0.10.0
libtpu: 0.0.40
codegen_flags: <defaults>
</compile_context>

<pallas_src>
import functools
import math

import jax
import jax.numpy as jnp
from jax import lax
from jax.experimental import pallas as pl
from jax.experimental.pallas import tpu as pltpu

_VMEM_LIMIT = 32 * 1024 * 1024  # tiles below stay << this on every generation


def _mosaic_params(semantics):
    return pltpu.CompilerParams(
        dimension_semantics=semantics, vmem_limit_bytes=_VMEM_LIMIT)


def _pick_tm(M, tm_max=1024):
    """Row tile: multiple of 8 (or full M); split so the parallel grid has >= 2
    blocks when possible (v7x has 2 TensorCores per chip)."""
    if M <= 8:
        return M
    if M > tm_max:
        return tm_max                      # tm_max is a multiple of 8
    tm = ((M // 2) + 7) // 8 * 8           # split a single-block grid in two
    if tm <= 0 or tm >= M:
        return M
    return tm


# -----------------------------------------------------------------------------
# Pallas kernels
# -----------------------------------------------------------------------------
def _matmul_kernel(x_ref, w_ref, o_ref):
    o_ref[...] = jnp.dot(x_ref[...], w_ref[...],
                         preferred_element_type=jnp.float32).astype(o_ref.dtype)


def _sr_conv_ln_kernel(x_ref, w_ref, b_ref, g_ref, bt_ref, o_ref, acc_ref, *, eps):
    # Spatial-reduction Conv2d(kernel=stride=sr) + bias + LayerNorm.
    # Grid = (B, sr): the dh (kernel-row) axis is the reduction axis.
    # x_ref:  (Hp, 1, Wp, sr*C)   rows h = hp*sr + dh of the image, all wp,
    #                             columns ordered (dw, c_in)
    # w_ref:  (sr*C, C)           conv weight slice for this dh
    # acc_ref:(Hp, Wp, C) f32     persistent accumulator
    dh = pl.program_id(1)

    @pl.when(dh == 0)
    def _init():
        acc_ref[...] = jnp.zeros_like(acc_ref)

    w = w_ref[...]
    hp_count = acc_ref.shape[0]
    for hp in range(hp_count):  # static unroll; Hp is small in PVTv2 (<= 7)
        acc_ref[hp] = acc_ref[hp] + jnp.dot(
            x_ref[hp, 0], w, preferred_element_type=jnp.float32)

    @pl.when(dh == pl.num_programs(1) - 1)
    def _finalize():
        acc = acc_ref[...] + b_ref[...]
        mu = jnp.mean(acc, axis=-1, keepdims=True)
        var = jnp.mean(jnp.square(acc - mu), axis=-1, keepdims=True)
        y = (acc - mu) * lax.rsqrt(var + eps)
        o_ref[...] = (y * g_ref[...] + bt_ref[...]).astype(o_ref.dtype)


def _fused_attn_kernel(x_ref, kv_ref, wq_ref, wp_ref, bp_ref, o_ref, *, num_heads):
    # Fused: q = x @ wq (scale folded in), per-head softmax attention, and the
    # output projection, all in one kernel.
    # x_ref : (TQ, C) bf16                 query-side input tile
    # kv_ref: (2*heads, Nk, hd) bf16       [k_0..k_{H-1}, v_0..v_{H-1}]
    # wq_ref: (heads, C, hd) bf16          q weight, head-major, scale folded in
    # wp_ref: (heads, hd, C) bf16          output-proj weight, head-major rows
    # bp_ref: (1, C) f32                   output-proj bias
    x = x_ref[...]
    acc = None
    for h in range(num_heads):  # static unroll; only leading-axis indexing
        q = jnp.dot(x, wq_ref[h], preferred_element_type=jnp.float32)   # (TQ, hd)
        k = kv_ref[h]                                                    # (Nk, hd)
        v = kv_ref[num_heads + h]                                        # (Nk, hd)
        # contract over the shared hd axis directly (no k.T materialization)
        s = lax.dot_general(q.astype(k.dtype), k, (((1,), (1,)), ((), ())),
                            preferred_element_type=jnp.float32)          # (TQ, Nk)
        s = s - jnp.max(s, axis=-1, keepdims=True)
        p = jnp.exp(s)
        p = p * pl.reciprocal(jnp.sum(p, axis=-1, keepdims=True), approx=True)
        o_h = jnp.dot(p.astype(v.dtype), v,
                      preferred_element_type=jnp.float32)                # (TQ, hd)
        contrib = jnp.dot(o_h.astype(wp_ref.dtype), wp_ref[h],
                          preferred_element_type=jnp.float32)            # (TQ, C)
        acc = contrib if acc is None else acc + contrib
    # single lane-dense (TQ, C) f32 epilogue + store
    o_ref[...] = (acc + bp_ref[...]).astype(o_ref.dtype)


# -----------------------------------------------------------------------------
# Wrappers
# -----------------------------------------------------------------------------
def matmul(x, w, *, out_dtype, tm=1024):
    """Plain GEMM (used for the kv projection; qkv_bias=False -> no bias)."""
    M, K = x.shape
    Kout = w.shape[1]
    tm = _pick_tm(M, tm)
    return pl.pallas_call(
        _matmul_kernel,
        out_shape=jax.ShapeDtypeStruct((M, Kout), out_dtype),
        grid=(pl.cdiv(M, tm),),
        in_specs=[pl.BlockSpec((tm, K), lambda i: (i, 0)),
                  pl.BlockSpec((K, Kout), lambda i: (0, 0))],
        out_specs=pl.BlockSpec((tm, Kout), lambda i: (i, 0)),
        compiler_params=_mosaic_params(("parallel",)),
    )(x, w)


def sr_conv_layernorm(x_bf, H, W, w_sr, b_sr, ln_g, ln_b, *, sr_ratio, out_dtype,
                      eps=1e-5):
    """Conv2d(C,C,kernel=sr,stride=sr) + bias + LayerNorm, with the patch
    extraction folded into the kernel (no XLA transpose / HBM materialization)."""
    B, N, C = x_bf.shape
    sr = sr_ratio
    Hp, Wp = H // sr, W // sr
    src = sr * C
    # Free reinterpretations (row-major token order): no data movement in HBM.
    x5 = x_bf.reshape(B, Hp, sr, Wp, src)          # (B, hp, dh, wp, (dw,c))
    w3 = w_sr.reshape(sr, src, C)                  # (dh, (dw,c_in), c_out)
    b2 = b_sr.reshape(1, C).astype(jnp.float32)
    g2 = ln_g.reshape(1, C).astype(jnp.float32)
    bt2 = ln_b.reshape(1, C).astype(jnp.float32)
    out = pl.pallas_call(
        functools.partial(_sr_conv_ln_kernel, eps=eps),
        out_shape=jax.ShapeDtypeStruct((B, Hp, Wp, C), out_dtype),
        grid=(B, sr),
        in_specs=[
            pl.BlockSpec((None, Hp, 1, Wp, src), lambda b, dh: (b, 0, dh, 0, 0)),
            pl.BlockSpec((None, src, C), lambda b, dh: (dh, 0, 0)),
            pl.BlockSpec((1, C), lambda b, dh: (0, 0)),
            pl.BlockSpec((1, C), lambda b, dh: (0, 0)),
            pl.BlockSpec((1, C), lambda b, dh: (0, 0)),
        ],
        out_specs=pl.BlockSpec((None, Hp, Wp, C), lambda b, dh: (b, 0, 0, 0)),
        scratch_shapes=[pltpu.VMEM((Hp, Wp, C), jnp.float32)],
        compiler_params=_mosaic_params(("parallel", "arbitrary")),
    )(x5, w3, b2, g2, bt2)
    return out.reshape(B, Hp * Wp, C)              # memory-identical reshape


def fused_attention(x, kv_h, wq_h, wp_h, b_proj, *, num_heads, out_dtype, tq=256):
    """x: (B, N, C) bf16, kv_h: (B, 2*heads, Nk, hd) bf16 -> (B, N, C)."""
    B, N, C = x.shape
    Nk, hd = kv_h.shape[2], kv_h.shape[3]
    tq = min(tq, N)
    if tq < N:
        tq = (tq // 8) * 8
    if N > 8 and B * pl.cdiv(N, tq) < 2:           # keep >= 2 parallel blocks
        half = ((N // 2) + 7) // 8 * 8
        if 0 < half < N:
            tq = half
    return pl.pallas_call(
        functools.partial(_fused_attn_kernel, num_heads=num_heads),
        out_shape=jax.ShapeDtypeStruct((B, N, C), out_dtype),
        grid=(B, pl.cdiv(N, tq)),
        in_specs=[
            pl.BlockSpec((None, tq, C), lambda b, i: (b, i, 0),
                         pipeline_mode=pl.Buffered(3)),
            pl.BlockSpec((None, 2 * num_heads, Nk, hd), lambda b, i: (b, 0, 0, 0)),
            pl.BlockSpec((num_heads, C, hd), lambda b, i: (0, 0, 0)),
            pl.BlockSpec((num_heads, hd, C), lambda b, i: (0, 0, 0)),
            pl.BlockSpec((1, C), lambda b, i: (0, 0)),
        ],
        out_specs=pl.BlockSpec((None, tq, C), lambda b, i: (b, i, 0)),
        compiler_params=_mosaic_params(("parallel", "parallel")),
    )(x, kv_h, wq_h, wp_h, b_proj)


# -----------------------------------------------------------------------------
# Attention module forward (glue in plain JAX, hot paths in Pallas)
# -----------------------------------------------------------------------------
def attention_forward(x, H, W, params, *, num_heads, sr_ratio):
    B, N, C = x.shape
    hd = C // num_heads
    scale = hd ** -0.5
    cdt = jnp.bfloat16  # MXU operand dtype; accumulation stays f32 in-kernel

    x_bf = x.astype(cdt)

    # Head-major weights; softmax scale folded into wq (free at runtime).
    wq_h = (params["wq"] * scale).reshape(C, num_heads, hd).transpose(1, 0, 2)
    wq_h = wq_h.astype(cdt)
    wp_h = params["w_proj"].reshape(num_heads, hd, C).astype(cdt)
    b_proj = params["b_proj"].reshape(1, C).astype(jnp.float32)
    wkv = params["wkv"].astype(cdt)

    # Spatial reduction (non-linear path) fused with bias + LayerNorm.
    if sr_ratio > 1:
        Nk = (H // sr_ratio) * (W // sr_ratio)
        x_red = sr_conv_layernorm(
            x_bf, H, W, params["w_sr"].astype(cdt), params["b_sr"],
            params["ln_g"], params["ln_b"], sr_ratio=sr_ratio, out_dtype=cdt)
        x_kv = x_red.reshape(B * Nk, C)
    else:
        Nk = N
        x_kv = x_bf.reshape(B * N, C)

    # kv projection (qkv_bias=False -> no bias), then re-layout the small kv
    # tensor head-major so the attention kernel never lane-slices.
    kv = matmul(x_kv, wkv, out_dtype=cdt)                        # (B*Nk, 2C)
    kv_h = kv.reshape(B, Nk, 2, num_heads, hd).transpose(0, 2, 3, 1, 4)
    kv_h = kv_h.reshape(B, 2 * num_heads, Nk, hd)

    # Fused q-proj + attention + out-proj (attn_drop/proj_drop p=0 -> identity).
    out = fused_attention(x_bf, kv_h, wq_h, wp_h, b_proj,
                          num_heads=num_heads, out_dtype=x.dtype)
    return out


# -----------------------------------------------------------------------------
# Pure-JAX f32 reference (mirrors the PyTorch forward)
# -----------------------------------------------------------------------------
def attention_reference(x, H, W, params, *, num_heads, sr_ratio):
    B, N, C = x.shape
    hd = C // num_heads
    scale = hd ** -0.5
    q = (x @ params["wq"] + params["bq"]).reshape(B, N, num_heads, hd)
    q = q.transpose(0, 2, 1, 3)
    if sr_ratio > 1:
        Hp, Wp = H // sr_ratio, W // sr_ratio
        Nk = Hp * Wp
        p = x.reshape(B, Hp, sr_ratio, Wp, sr_ratio, C).transpose(0, 1, 3, 2, 4, 5)
        p = p.reshape(B, Nk, sr_ratio * sr_ratio * C)
        x_ = p @ params["w_sr"] + params["b_sr"]
        mu = x_.mean(-1, keepdims=True)
        var = ((x_ - mu) ** 2).mean(-1, keepdims=True)
        x_ = (x_ - mu) / jnp.sqrt(var + 1e-5) * params["ln_g"] + params["ln_b"]
    else:
        Nk = N
        x_ = x
    kv = (x_ @ params["wkv"] + params["bkv"]).reshape(B, Nk, 2, num_heads, hd)
    kv = kv.transpose(2, 0, 3, 1, 4)
    k, v = kv[0], kv[1]
    attn = jax.nn.softmax((q @ k.transpose(0, 1, 3, 2)) * scale, axis=-1)
    o = (attn @ v).transpose(0, 2, 1, 3).reshape(B, N, C)
    return o @ params["w_proj"] + params["b_proj"]


# -----------------------------------------------------------------------------
# Deterministic parameter init (mirrors Attention._init_weights shapes/values)
# -----------------------------------------------------------------------------
def init_params(key, dim, sr_ratio):
    ks = jax.random.split(key, 4)
    fan_out = sr_ratio * sr_ratio * dim  # Conv2d fan_out init
    return {
        # nn.Linear(dim, dim, bias=False) -> (in, out) layout
        "wq": 0.02 * jax.random.normal(ks[0], (dim, dim), jnp.float32),
        "bq": jnp.zeros((dim,), jnp.float32),
        # nn.Linear(dim, 2*dim, bias=False)
        "wkv": 0.02 * jax.random.normal(ks[1], (dim, 2 * dim), jnp.float32),
        "bkv": jnp.zeros((2 * dim,), jnp.float32),
        # nn.Conv2d(dim, dim, kernel=sr, stride=sr), folded to (sr*sr*dim, dim)
        "w_sr": math.sqrt(2.0 / fan_out)
        * jax.random.normal(ks[2], (sr_ratio * sr_ratio * dim, dim), jnp.float32),
        "b_sr": jnp.zeros((dim,), jnp.float32),
        # nn.LayerNorm(dim): weight=1, bias=0
        "ln_g": jnp.ones((dim,), jnp.float32),
        "ln_b": jnp.zeros((dim,), jnp.float32),
        # nn.Linear(dim, dim) projection
        "w_proj": 0.02 * jax.random.normal(ks[3], (dim, dim), jnp.float32),
        "b_proj": jnp.zeros((dim,), jnp.float32),
    }


if __name__ == "__main__":
    B, H, W, C = 2, 8, 8, 32
    num_heads = 4
    N = H * W

    key = jax.random.PRNGKey(0)
    kx, kp = jax.random.split(key)
    x = jax.random.normal(kx, (B, N, C), jnp.float32)

    # Check both the sr_ratio>1 (stages 1-3) and sr_ratio=1 (stage 4) branches.
    for sr_ratio in (2, 1):
        params = init_params(kp, C, sr_ratio)

        out = attention_forward(x, H, W, params,
                                num_heads=num_heads, sr_ratio=sr_ratio)
        out = jax.block_until_ready(out)

        ref = attention_reference(x, H, W, params,
                                  num_heads=num_heads, sr_ratio=sr_ratio)
        ref = jax.block_until_ready(ref)

        assert out.shape == (B, N, C), out.shape
        # bf16 MXU operands (f32 accumulation) -> compare against f32 reference
        # at a bf16-appropriate tolerance.
        max_err = float(jnp.max(jnp.abs(out - ref)))
        assert jnp.allclose(out, ref, atol=1e-2, rtol=1e-2), (sr_ratio, max_err)

    print("KERNEL_OK")
</pallas_src>

<mosaic_0001>
module attributes {stable_mosaic.version = 11 : i64} {
  func.func @_sr_conv_ln_kernel(%arg0: i32, %arg1: i32, %arg2: memref<1x4x1x4x64xbf16, #tpu.memory_space<vmem>>, %arg3: memref<1x64x32xbf16, #tpu.memory_space<vmem>>, %arg4: memref<1x32xf32, #tpu.memory_space<vmem>>, %arg5: memref<1x32xf32, #tpu.memory_space<vmem>>, %arg6: memref<1x32xf32, #tpu.memory_space<vmem>>, %arg7: memref<1x4x4x32xbf16, #tpu.memory_space<vmem>>, %arg8: memref<4x4x32xf32, #tpu.memory_space<vmem>>) attributes {dimension_semantics = [#tpu.dimension_semantics<parallel>, #tpu.dimension_semantics<arbitrary>], iteration_bounds = array<i64: 2, 2>, scalar_prefetch = 0 : i64, scratch_operands = 1 : i64, tpu.core_type = #tpu.core_type<tc>, window_params = [{transform_indices = @transform_0, window_bounds = array<i64: 1, 4, 1, 4, 64>}, {transform_indices = @transform_1, window_bounds = array<i64: 1, 64, 32>}, {pipeline_mode = #tpu.pipeline_mode<synchronous>, transform_indices = @transform_2, window_bounds = array<i64: 1, 32>}, {pipeline_mode = #tpu.pipeline_mode<synchronous>, transform_indices = @transform_3, window_bounds = array<i64: 1, 32>}, {pipeline_mode = #tpu.pipeline_mode<synchronous>, transform_indices = @transform_4, window_bounds = array<i64: 1, 32>}, {transform_indices = @transform_5, window_bounds = array<i64: 1, 4, 4, 32>}]} {
    %c0_i32 = arith.constant 0 : i32
    %0 = arith.cmpi eq, %arg1, %c0_i32 : i32
    %1 = arith.extui %0 : i1 to i32
    %c0_i32_0 = arith.constant 0 : i32
    %2 = arith.cmpi ne, %1, %c0_i32_0 : i32
    scf.if %2 {
      %cst_48 = arith.constant 0.000000e+00 : f32
      %44 = vector.broadcast %cst_48 : f32 to vector<4x4x32xf32>
      %c0_49 = arith.constant 0 : index
      %c0_50 = arith.constant 0 : index
      %c0_51 = arith.constant 0 : index
      %45 = vector.load %arg8[%c0_49, %c0_50, %c0_51] : memref<4x4x32xf32, #tpu.memory_space<vmem>>, vector<4x4x32xf32>
      tpu.vector_store %arg8[%c0_49, %c0_50, %c0_51], %44 {strides = array<i32>} : memref<4x4x32xf32, #tpu.memory_space<vmem>>, vector<4x4x32xf32>,
    } else {
    }
    %c0 = arith.constant 0 : index
    %c0_1 = arith.constant 0 : index
    %c0_2 = arith.constant 0 : index
    %3 = vector.load %arg3[%c0, %c0_1, %c0_2] : memref<1x64x32xbf16, #tpu.memory_space<vmem>>, vector<1x64x32xbf16>
    %4 = vector.shape_cast %3 : vector<1x64x32xbf16> to vector<64x32xbf16>
    %c0_3 = arith.constant 0 : index
    %c0_4 = arith.constant 0 : index
    %c0_5 = arith.constant 0 : index
    %5 = vector.load %arg8[%c0_3, %c0_4, %c0_5] : memref<4x4x32xf32, #tpu.memory_space<vmem>>, vector<1x4x32xf32>
    %6 = vector.shape_cast %5 : vector<1x4x32xf32> to vector<4x32xf32>
    %c0_6 = arith.constant 0 : index
    %c0_7 = arith.constant 0 : index
    %c0_8 = arith.constant 0 : index
    %c0_9 = arith.constant 0 : index
    %c0_10 = arith.constant 0 : index
    %7 = vector.load %arg2[%c0_6, %c0_7, %c0_8, %c0_9, %c0_10] : memref<1x4x1x4x64xbf16, #tpu.memory_space<vmem>>, vector<1x1x1x4x64xbf16>
    %8 = vector.shape_cast %7 : vector<1x1x1x4x64xbf16> to vector<4x64xbf16>
    %cst = arith.constant dense<0.000000e+00> : vector<4x32xf32>
    %9 = tpu.matmul %8, %4, %cst {dimension_numbers = #tpu.dot_dimension_numbers<[1], [0], [0], [1], [0, 0, 1, 1], [], []>} : vector<4x64xbf16>, vector<64x32xbf16>, vector<4x32xf32> -> vector<4x32xf32>
    %10 = arith.addf %6, %9 : vector<4x32xf32>
    %c0_11 = arith.constant 0 : index
    %c0_12 = arith.constant 0 : index
    %c0_13 = arith.constant 0 : index
    %11 = vector.load %arg8[%c0_11, %c0_12, %c0_13] : memref<4x4x32xf32, #tpu.memory_space<vmem>>, vector<1x4x32xf32>
    %12 = vector.shape_cast %11 : vector<1x4x32xf32> to vector<4x32xf32>
    %13 = vector.shape_cast %10 : vector<4x32xf32> to vector<1x4x32xf32>
    tpu.vector_store %arg8[%c0_11, %c0_12, %c0_13], %13 {strides = array<i32>} : memref<4x4x32xf32, #tpu.memory_space<vmem>>, vector<1x4x32xf32>,
    %c1 = arith.constant 1 : index
    %c0_14 = arith.constant 0 : index
    %c0_15 = arith.constant 0 : index
    %14 = vector.load %arg8[%c1, %c0_14, %c0_15] : memref<4x4x32xf32, #tpu.memory_space<vmem>>, vector<1x4x32xf32>
    %15 = vector.shape_cast %14 : vector<1x4x32xf32> to vector<4x32xf32>
    %c0_16 = arith.constant 0 : index
    %c1_17 = arith.constant 1 : index
    %c0_18 = arith.constant 0 : index
    %c0_19 = arith.constant 0 : index
    %c0_20 = arith.constant 0 : index
    %16 = vector.load %arg2[%c0_16, %c1_17, %c0_18, %c0_19, %c0_20] : memref<1x4x1x4x64xbf16, #tpu.memory_space<vmem>>, vector<1x1x1x4x64xbf16>
    %17 = vector.shape_cast %16 : vector<1x1x1x4x64xbf16> to vector<4x64xbf16>
    %cst_21 = arith.constant dense<0.000000e+00> : vector<4x32xf32>
    %18 = tpu.matmul %17, %4, %cst_21 {dimension_numbers = #tpu.dot_dimension_numbers<[1], [0], [0], [1], [0, 0, 1, 1], [], []>} : vector<4x64xbf16>, vector<64x32xbf16>, vector<4x32xf32> -> vector<4x32xf32>
    %19 = arith.addf %15, %18 : vector<4x32xf32>
    %c1_22 = arith.constant 1 : index
    %c0_23 = arith.constant 0 : index
    %c0_24 = arith.constant 0 : index
    %20 = vector.load %arg8[%c1_22, %c0_23, %c0_24] : memref<4x4x32xf32, #tpu.memory_space<vmem>>, vector<1x4x32xf32>
    %21 = vector.shape_cast %20 : vector<1x4x32xf32> to vector<4x32xf32>
    %22 = vector.shape_cast %19 : vector<4x32xf32> to vector<1x4x32xf32>
    tpu.vector_store %arg8[%c1_22, %c0_23, %c0_24], %22 {strides = array<i32>} : memref<4x4x32xf32, #tpu.memory_space<vmem>>, vector<1x4x32xf32>,
    %c2 = arith.constant 2 : index
    %c0_25 = arith.constant 0 : index
    %c0_26 = arith.constant 0 : index
    %23 = vector.load %arg8[%c2, %c0_25, %c0_26] : memref<4x4x32xf32, #tpu.memory_space<vmem>>, vector<1x4x32xf32>
    %24 = vector.shape_cast %23 : vector<1x4x32xf32> to vector<4x32xf32>
    %c0_27 = arith.constant 0 : index
    %c2_28 = arith.constant 2 : index
    %c0_29 = arith.constant 0 : index
    %c0_30 = arith.constant 0 : index
    %c0_31 = arith.constant 0 : index
    %25 = vector.load %arg2[%c0_27, %c2_28, %c0_29, %c0_30, %c0_31] : memref<1x4x1x4x64xbf16, #tpu.memory_space<vmem>>, vector<1x1x1x4x64xbf16>
    %26 = vector.shape_cast %25 : vector<1x1x1x4x64xbf16> to vector<4x64xbf16>
    %cst_32 = arith.constant dense<0.000000e+00> : vector<4x32xf32>
    %27 = tpu.matmul %26, %4, %cst_32 {dimension_numbers = #tpu.dot_dimension_numbers<[1], [0], [0], [1], [0, 0, 1, 1], [], []>} : vector<4x64xbf16>, vector<64x32xbf16>, vector<4x32xf32> -> vector<4x32xf32>
    %28 = arith.addf %24, %27 : vector<4x32xf32>
    %c2_33 = arith.constant 2 : index
    %c0_34 = arith.constant 0 : index
    %c0_35 = arith.constant 0 : index
    %29 = vector.load %arg8[%c2_33, %c0_34, %c0_35] : memref<4x4x32xf32, #tpu.memory_space<vmem>>, vector<1x4x32xf32>
    %30 = vector.shape_cast %29 : vector<1x4x32xf32> to vector<4x32xf32>
    %31 = vector.shape_cast %28 : vector<4x32xf32> to vector<1x4x32xf32>
    tpu.vector_store %arg8[%c2_33, %c0_34, %c0_35], %31 {strides = array<i32>} : memref<4x4x32xf32, #tpu.memory_space<vmem>>, vector<1x4x32xf32>,
    %c3 = arith.constant 3 : index
    %c0_36 = arith.constant 0 : index
    %c0_37 = arith.constant 0 : index
    %32 = vector.load %arg8[%c3, %c0_36, %c0_37] : memref<4x4x32xf32, #tpu.memory_space<vmem>>, vector<1x4x32xf32>
    %33 = vector.shape_cast %32 : vector<1x4x32xf32> to vector<4x32xf32>
    %c0_38 = arith.constant 0 : index
    %c3_39 = arith.constant 3 : index
    %c0_40 = arith.constant 0 : index
    %c0_41 = arith.constant 0 : index
    %c0_42 = arith.constant 0 : index
    %34 = vector.load %arg2[%c0_38, %c3_39, %c0_40, %c0_41, %c0_42] : memref<1x4x1x4x64xbf16, #tpu.memory_space<vmem>>, vector<1x1x1x4x64xbf16>
    %35 = vector.shape_cast %34 : vector<1x1x1x4x64xbf16> to vector<4x64xbf16>
    %cst_43 = arith.constant dense<0.000000e+00> : vector<4x32xf32>
    %36 = tpu.matmul %35, %4, %cst_43 {dimension_numbers = #tpu.dot_dimension_numbers<[1], [0], [0], [1], [0, 0, 1, 1], [], []>} : vector<4x64xbf16>, vector<64x32xbf16>, vector<4x32xf32> -> vector<4x32xf32>
    %37 = arith.addf %33, %36 : vector<4x32xf32>
    %c3_44 = arith.constant 3 : index
    %c0_45 = arith.constant 0 : index
    %c0_46 = arith.constant 0 : index
    %38 = vector.load %arg8[%c3_44, %c0_45, %c0_46] : memref<4x4x32xf32, #tpu.memory_space<vmem>>, vector<1x4x32xf32>
    %39 = vector.shape_cast %38 : vector<1x4x32xf32> to vector<4x32xf32>
    %40 = vector.shape_cast %37 : vector<4x32xf32> to vector<1x4x32xf32>
    tpu.vector_store %arg8[%c3_44, %c0_45, %c0_46], %40 {strides = array<i32>} : memref<4x4x32xf32, #tpu.memory_space<vmem>>, vector<1x4x32xf32>,
    %c1_i32 = arith.constant 1 : i32
    %41 = arith.cmpi eq, %arg1, %c1_i32 : i32
    %42 = arith.extui %41 : i1 to i32
    %c0_i32_47 = arith.constant 0 : i32
    %43 = arith.cmpi ne, %42, %c0_i32_47 : i32
    scf.if %43 {
      %c0_48 = arith.constant 0 : index
      %c0_49 = arith.constant 0 : index
      %c0_50 = arith.constant 0 : index
      %44 = vector.load %arg8[%c0_48, %c0_49, %c0_50] : memref<4x4x32xf32, #tpu.memory_space<vmem>>, vector<4x4x32xf32>
      %c0_51 = arith.constant 0 : index
      %c0_52 = arith.constant 0 : index
      %45 = vector.load %arg4[%c0_51, %c0_52] : memref<1x32xf32, #tpu.memory_space<vmem>>, vector<1x32xf32>
      %46 = vector.shape_cast %45 : vector<1x32xf32> to vector<1x1x32xf32>
      %47 = vector.broadcast %46 : vector<1x1x32xf32> to vector<4x4x32xf32>
      %48 = arith.addf %44, %47 : vector<4x4x32xf32>
      %cst_53 = arith.constant dense<0.000000e+00> : vector<4x4xf32>
      %49 = vector.multi_reduction <add>, %48, %cst_53 [2] : vector<4x4x32xf32> to vector<4x4xf32>
      %50 = vector.shape_cast %49 : vector<4x4xf32> to vector<4x4x1xf32>
      %cst_54 = arith.constant 3.200000e+01 : f32
      %51 = vector.broadcast %cst_54 : f32 to vector<4x4x1xf32>
      %52 = arith.divf %50, %51 : vector<4x4x1xf32>
      %53 = vector.broadcast %52 : vector<4x4x1xf32> to vector<4x4x32xf32>
      %54 = arith.subf %48, %53 : vector<4x4x32xf32>
      %55 = arith.mulf %54, %54 : vector<4x4x32xf32>
      %cst_55 = arith.constant dense<0.000000e+00> : vector<4x4xf32>
      %56 = vector.multi_reduction <add>, %55, %cst_55 [2] : vector<4x4x32xf32> to vector<4x4xf32>
      %57 = vector.shape_cast %56 : vector<4x4xf32> to vector<4x4x1xf32>
      %cst_56 = arith.constant 3.200000e+01 : f32
      %58 = vector.broadcast %cst_56 : f32 to vector<4x4x1xf32>
      %59 = arith.divf %57, %58 : vector<4x4x1xf32>
      %60 = vector.broadcast %52 : vector<4x4x1xf32> to vector<4x4x32xf32>
      %61 = arith.subf %48, %60 : vector<4x4x32xf32>
      %cst_57 = arith.constant 9.99999974E-6 : f32
      %62 = vector.broadcast %cst_57 : f32 to vector<4x4x1xf32>
      %63 = arith.addf %59, %62 : vector<4x4x1xf32>
      %64 = math.rsqrt %63 : vector<4x4x1xf32>
      %65 = vector.broadcast %64 : vector<4x4x1xf32> to vector<4x4x32xf32>
      %66 = arith.mulf %61, %65 : vector<4x4x32xf32>
      %c0_58 = arith.constant 0 : index
      %c0_59 = arith.constant 0 : index
      %67 = vector.load %arg5[%c0_58, %c0_59] : memref<1x32xf32, #tpu.memory_space<vmem>>, vector<1x32xf32>
      %68 = vector.shape_cast %67 : vector<1x32xf32> to vector<1x1x32xf32>
      %69 = vector.broadcast %68 : vector<1x1x32xf32> to vector<4x4x32xf32>
      %70 = arith.mulf %66, %69 : vector<4x4x32xf32>
      %c0_60 = arith.constant 0 : index
      %c0_61 = arith.constant 0 : index
      %71 = vector.load %arg6[%c0_60, %c0_61] : memref<1x32xf32, #tpu.memory_space<vmem>>, vector<1x32xf32>
      %72 = vector.shape_cast %71 : vector<1x32xf32> to vector<1x1x32xf32>
      %73 = vector.broadcast %72 : vector<1x1x32xf32> to vector<4x4x32xf32>
      %74 = arith.addf %70, %73 : vector<4x4x32xf32>
      %75 = arith.truncf %74 : vector<4x4x32xf32> to vector<4x4x32xbf16>
      %c0_62 = arith.constant 0 : index
      %c0_63 = arith.constant 0 : index
      %c0_64 = arith.constant 0 : index
      %c0_65 = arith.constant 0 : index
      %76 = vector.load %arg7[%c0_62, %c0_63, %c0_64, %c0_65] : memref<1x4x4x32xbf16, #tpu.memory_space<vmem>>, vector<1x4x4x32xbf16>
      %77 = vector.shape_cast %76 : vector<1x4x4x32xbf16> to vector<4x4x32xbf16>
      %78 = vector.shape_cast %75 : vector<4x4x32xbf16> to vector<1x4x4x32xbf16>
      tpu.vector_store %arg7[%c0_62, %c0_63, %c0_64, %c0_65], %78 {strides = array<i32>} : memref<1x4x4x32xbf16, #tpu.memory_space<vmem>>, vector<1x4x4x32xbf16>,
    } else {
    }
    return
  }
  func.func @transform_0(%arg0: i32, %arg1: i32) -> (i32, i32, i32, i32, i32) {
    %c0_i32 = arith.constant 0 : i32
    %c0_i32_0 = arith.constant 0 : i32
    %c0_i32_1 = arith.constant 0 : i32
    %c0_i32_2 = arith.constant 0 : i32
    return %arg0, %c0_i32, %arg1, %c0_i32_0, %c0_i32_1 : i32, i32, i32, i32, i32
  }
  func.func @transform_1(%arg0: i32, %arg1: i32) -> (i32, i32, i32) {
    %c0_i32 = arith.constant 0 : i32
    %c0_i32_0 = arith.constant 0 : i32
    %c0_i32_1 = arith.constant 0 : i32
    return %arg1, %c0_i32, %c0_i32_0 : i32, i32, i32
  }
  func.func @transform_2(%arg0: i32, %arg1: i32) -> (i32, i32) {
    %c0_i32 = arith.constant 0 : i32
    %c0_i32_0 = arith.constant 0 : i32
    %c0_i32_1 = arith.constant 0 : i32
    return %c0_i32, %c0_i32_0 : i32, i32
  }
  func.func @transform_3(%arg0: i32, %arg1: i32) -> (i32, i32) {
    %c0_i32 = arith.constant 0 : i32
    %c0_i32_0 = arith.constant 0 : i32
    %c0_i32_1 = arith.constant 0 : i32
    return %c0_i32, %c0_i32_0 : i32, i32
  }
  func.func @transform_4(%arg0: i32, %arg1: i32) -> (i32, i32) {
    %c0_i32 = arith.constant 0 : i32
    %c0_i32_0 = arith.constant 0 : i32
    %c0_i32_1 = arith.constant 0 : i32
    return %c0_i32, %c0_i32_0 : i32, i32
  }
  func.func @transform_5(%arg0: i32, %arg1: i32) -> (i32, i32, i32, i32) {
    %c0_i32 = arith.constant 0 : i32
    %c0_i32_0 = arith.constant 0 : i32
    %c0_i32_1 = arith.constant 0 : i32
    %c0_i32_2 = arith.constant 0 : i32
    return %arg0, %c0_i32, %c0_i32_0, %c0_i32_1 : i32, i32, i32, i32
  }
}

</mosaic_0001>

<bundles_post_ra>
// kernel: tpu_custom_call.1
= control target key start
LH: loop header
LB: loop body
LE: loop exit
PB: predicated region body
PF: predicated region fallthrough
CT: control target
= control target key end

     0   :  { %s1347_s0 = inlined_call_operand.vmem [shape: bf16[2,4,2,4,64], index: 0, kind: input, shape index: {}]   ;;  %s1348_s1 = inlined_call_operand.vmem [shape: bf16[2,64,32], index: 1, kind: input, shape index: {}]   ;;  %s1349_s2 = inlined_call_operand.vmem [shape: f32[1,32], index: 2, kind: input, shape index: {}]   ;;  %s1350_s3 = inlined_call_operand.vmem [shape: f32[1,32], index: 3, kind: input, shape index: {}]   ;;  %s1351_s4 = inlined_call_operand.vmem [shape: f32[1,32], index: 4, kind: input, shape index: {}]   ;;  %s1352_s5 = inlined_call_operand.hbm [shape: bf16[2,4,4,32], index: 5, kind: output, shape index: {}]  }
   0x1   :  { %1354 = sst [smem:[#allocation8_spill]] %s1347_s0 }
   0x2   :  { %10 = vsyncpa [#allocation5], 0 }
   0x3   :  { %12 = vsyncpa [#allocation5 + $0x1], 0  ;;  %s1115_s18 = smov 0   ;;  %s1117_s19 = smov 0  }
   0x4   :  { %s1119_s20 = smov 0   ;;  %s1121_s21 = smov 0  }
   0x5   :  { %s1123_s22 = smov 0   ;;  %s1125_s23 = smov 0  }
   0x6   :  { %s1127_s24 = smov 0   ;;  %s1129_s25 = smov 0  }
   0x7   :  { %s1131_s26 = smov 0   ;;  %s1133_s27 = smov 0  }
   0x8 LB: > { %s760_s28 = sadd.s32 4294967295, %s1077_s27   ;;  %s761_s29 = sadd.s32 4294967294, %s1077_s27   ;;  %s1077_s27 = sphi %s1133_s27, %s18_s27   ;;  %s1073_s26 = sphi %s1131_s26, %s1369_s26   ;;  %s1069_s25 = sphi %s1129_s25, %s1368_s25   ;;  %s1065_s24 = sphi %s1127_s24, %s1367_s24   ;;  %s1061_s23 = sphi %s1125_s23, %s1366_s23   ;;  %s1057_s22 = sphi %s1123_s22, %s1365_s22   ;;  %s1053_s21 = sphi %s1121_s21, %s1364_s21   ;;  %s1049_s20 = sphi %s1119_s20, %s1363_s20   ;;  %s1045_s19 = sphi %s1117_s19, %s1362_s19   ;;  %s1041_s18 = sphi %s1115_s18, %s1361_s18  }
   0x9   : > { %s27_s30 = sadd.s32 1, %s1069_s25  ;;  %s30_s6 = sadd.s32 1, %s1073_s26 }
   0xa   : > { %p28_p0 = scmp.ge.s32.totalorder %s27_s30, 2  ;;  %s39_s7 = sadd.s32 1, %s1057_s22 }
   0xb   : > { %p46_p1 = scmp.ne.s32.totalorder %s1057_s22, %s1053_s21  ;;  %p47_p2 = scmp.eq.s32.totalorder %s1077_s27, 0 }
   0xc   : > { %s1371_s30 = smov (%p28_p0, %s27_s30), 0  ;;  %s1373_s6 = smov (!%p28_p0, %s30_s6), %s1073_s26 }
   0xd   : > { %s35_s8 = ssub.s32 %s1069_s25, %s1371_s30  ;;  %p1178_p3 = por %p47_p2, %p46_p1 }
   0xe   : > { %p32_p4 = scmp.ge.s32.totalorder %s1373_s6, 2  ;;  %s154_s10 = sadd.s32 1, %s1049_s20 }
   0xf   : > { %p164_p5 = scmp.ne.s32.totalorder %s1049_s20, %s1045_s19  ;;  %p165_p6 = scmp.eq.s32.totalorder %s760_s28, 3 }
  0x10   : > { %s1375_s6 = smov (%p32_p4, %s1373_s6), 0  ;;  %p170_p8 = scmp.ne.s32.totalorder %s1045_s19, %s1041_s18 }
  0x11   : > { %1356 = sst [smem:[#allocation7_spill]] %s1375_s6  ;;  %p1187_p7 = por %p165_p6, %p164_p5 }
  0x12   : > { %s34_s12 = ssub.s32 %s1073_s26, %s1375_s6  ;;  %p171_p9 = scmp.eq.s32.totalorder %s761_s29, 3 }
  0x13   : > { %s36_s13 = sor.u32 %s35_s8, %s34_s12  ;;  %p152_p10 = scmp.eq.s32.totalorder %s34_s12, 0 }
  0x14   : > { %p37_p11 = scmp.eq.s32.totalorder %s36_s13, 0  ;;  %p1195_p12 = por %p171_p9, %p170_p8 }
  0x15   : > { %s1200_s15 = scalar_select %p152_p10, %s1049_s20, %s154_s10  }
  0x16   : > { %s1203_s16 = scalar_select %p37_p11, %s1057_s22, %s39_s7  }
  0x17   : > { %p763_p13 = scmp.ge.s32.totalorder %s1077_s27, 4 }
  0x19   : > { %196 = sbr.rel (%p763_p13) target bundleno = 44 (0x2c), region = 28 }
  0x20   : > { %199 = sbr.rel (!%p1178_p3) target bundleno = 44 (0x2c), region = 32  ;;  %s201_s17 = sand.u32 (%p1178_p3), 1, %s1057_s22  }
  0x21   : > { %s765_s28 = sshll.u32 (%p1178_p3), %s1073_s26, 3  ;;  %s764_s29 = sshll.u32 (%p1178_p3), %s201_s17, 3 }
  0x22   : > { %s205_s8 = sadd.s32 (%p1178_p3), %s1069_s25, %s765_s28  ;;  %s1359_s0 = sld [smem:[#allocation8_spill]] (%p1178_p3) }
  0x23   : > { %s766_s12 = sshll.u32 (%p1178_p3), %s205_s8, 1  ;;  %s203_s7 = scalar_lea.vmem (%p1178_p3), [#allocation3], %s764_s29 }
  0x28   : > { %s207_s10 = scalar_lea.vmem %s1359_s0, %s766_s12 }
  0x29   : > { %v223_v0 = vld [vmem:[%s207_s10] sm:$0x3]  ;;  %v225_v1 = vld [vmem:[%s207_s10 + $0x4] sm:$0x3]  ;;  %v227_v2 = vld [vmem:[%s207_s10 + $0x8] sm:$0x3] }
  0x2a   : > { %224 = vst [vmem:[%s203_s7] sm:$0x3] %v223_v0  ;;  %226 = vst [vmem:[%s203_s7 + $0x2] sm:$0x3] %v225_v1  ;;  %v229_v3 = vld [vmem:[%s207_s10 + $0xc] sm:$0x3] }
  0x2b   : > { %228 = vst [vmem:[%s203_s7 + $0x4] sm:$0x3] %v227_v2  ;;  %230 = vst [vmem:[%s203_s7 + $0x6] sm:$0x3] %v229_v3 }
  0x2c PF: > { %p767_p0 = scmp.ge.s32.totalorder %s1077_s27, 1  ;;  %p268_p1 = scmp.lt.s32.totalorder %s1077_s27, 5 }
  0x2e   : > { %p269_p2 = pnand %p767_p0, %p268_p1 }
  0x2f   : > { %s275_s6 = sand.u32 (!%p269_p2), 1, %s1053_s21   ;;  %s304_s9 = sand.u32 (!%p269_p2), 1, %s1045_s19  }
  0x30   : > { %272 = sbr.rel (%p269_p2) target bundleno = 665 (0x299), region = 77  ;;  %s768_s17 = sshll.u32 (!%p269_p2), %s275_s6, 3 }
  0x31   : > { %s769_s28 = sshll.u32 (!%p269_p2), %s304_s9, 3  ;;  %p307_p3 = scmp.lt.s32.totalorder (!%p269_p2), %s1061_s23, 1 }
  0x32   : > { %s1227_s7 = scalar_lea.vmem (!%p269_p2), [#allocation3], %s768_s17  ;;  %s1229_s0 = scalar_lea.vmem (!%p269_p2), [#allocation4], %s769_s28 }
  0x33   : > { %p772_p4 = scmp.ne.s32.totalorder (!%p269_p2), %s1061_s23, 0 }
  0x37   : > { %s308_s29 = scalar_select %p307_p3, %s1061_s23, 1 }
  0x38   : > { %316 = sbr.rel (%p772_p4) target bundleno = 63 (0x3f), region = 85  ;;  %vm317_vm0 = vcmask (!%p772_p4), 257024   ;;  %v1079_v4 = vmov (!%p772_p4), 0.0  }
  0x39   : > { %s793_s8 = sshll.u32 %s308_s29, 5  ;;  %318 = vst.msk [vmem:[#allocation2] sm:$0xf] (!%p772_p4), %vm317_vm0, %v1079_v4  ;;  %319 = vst.msk [vmem:[#allocation2 + $0x4] sm:$0xf] (!%p772_p4), %vm317_vm0, %v1079_v4 }
  0x3a   : > { %s1225_s10 = scalar_lea.vmem %s1348_s1, %s793_s8  ;;  %320 = vst.msk [vmem:[#allocation2 + $0x8] sm:$0xf] (!%p772_p4), %vm317_vm0, %v1079_v4  ;;  %321 = vst.msk [vmem:[#allocation2 + $0xc] sm:$0xf] (!%p772_p4), %vm317_vm0, %v1079_v4 }
  0x3f PF: > { %v955_v5 = vld [vmem:[%s1225_s10] sm:$0xff]   ;;  %v1080_v6 = vmov 0.0   ;;  %v956_v7 = vld [vmem:[%s1225_s10 + $0x8] sm:$0xff]   ;;  %vm1081_vm1 = vmmov 0   ;;  %v957_v8 = vld [vmem:[%s1225_s10 + $0x10] sm:$0xff]   ;;  %vm356_vm2 = vcmask 523264  }
  0x40   : > { %815 = vmatprep.subr.bf16.mxu0 %v1080_v6  ;;  %827 = vmatprep.subr.bf16.mxu1 %v1080_v6  ;;  %v958_v9 = vld [vmem:[%s1225_s10 + $0x18] sm:$0xff]   ;;  %v330_v14 = vld [vmem:[#allocation2] sm:$0xf]  ;;  %v404_v15 = vld [vmem:[#allocation2 + $0x4] sm:$0xf]  ;;  %vm401_vm3 = vcmask 257024  }
  0x41   : > { %816 = vmatpush3.bf16.msra.mxu0 %v955_v5  ;;  %828 = vmatpush3.bf16.msra.mxu1 %v955_v5  ;;  %v331_v10 = vld [vmem:[%s1227_s7] sm:$0x3]  ;;  %v778_v11 = vld [vmem:[%s1227_s7 + $0x2] sm:$0x3]  ;;  %v780_v12 = vld [vmem:[%s1227_s7 + $0x4] sm:$0x3] }
  0x42   : > { %817 = vmatprep.subr.bf16.mxu0 %v1080_v6  ;;  %829 = vmatprep.subr.bf16.mxu1 %v1080_v6  ;;  %v782_v13 = vld [vmem:[%s1227_s7 + $0x6] sm:$0x3]  ;;  %v453_v26 = vld [vmem:[#allocation2 + $0x8] sm:$0xf]  ;;  %v502_v27 = vld [vmem:[#allocation2 + $0xc] sm:$0xf] }
  0x43   : > { %823 = vmatprep.mubr.msk.bf16.mxu0 %vm1081_vm1, %v1080_v6  ;;  %835 = vmatprep.mubr.msk.bf16.mxu1 %vm1081_vm1, %v1080_v6  ;;  %p784_p5 = scmp.ne.s32.totalorder %s1061_s23, 1 }
  0x44   : > { %v785_v39 = vld [vmem:[%s1349_s2] ss:$0 sm:$0xff] (!%p784_p5)  ;;  %vm648_vm4 = vcmask (!%p784_p5), 254976  }
  0x45   : > { %818 = vmatpush3.bf16.msra.mxu0 %v956_v7  ;;  %830 = vmatpush3.bf16.msra.mxu1 %v956_v7 }
  0x46   : > { %819 = vmatprep.subr.bf16.mxu0 %v1080_v6  ;;  %831 = vmatprep.subr.bf16.mxu1 %v1080_v6 }
  0x49   : > { %820 = vmatpush3.bf16.msra.mxu0 %v957_v8  ;;  %832 = vmatpush3.bf16.msra.mxu1 %v957_v8 }
  0x4a   : > { %821 = vmatprep.subr.bf16.mxu0 %v1080_v6  ;;  %833 = vmatprep.subr.bf16.mxu1 %v1080_v6 }
  0x4d   : > { %822 = vmatpush3.bf16.msra.mxu0 %v958_v9  ;;  %834 = vmatpush3.bf16.msra.mxu1 %v958_v9 }
  0x4e   : > { %839 = vmatprep.subr.bf16.mxu0 %v1080_v6  ;;  %851 = vmatprep.subr.bf16.mxu1 %v1080_v6 }
  0x50   : > { %824 = vmatmul.mubr.msk.bf16.vlgmr.msra.gmra.mrb[0].mxu0 %vm356_vm2, %v331_v10  ;;  %836 = vmatmul.mubr.msk.bf16.vlgmr.msra.gmra.mrb[0].mxu1 %vm356_vm2, %v778_v11 }
  0x51   : > { %840 = vmatpush3.bf16.msra.mxu0 %v955_v5  ;;  %852 = vmatpush3.bf16.msra.mxu1 %v955_v5 }
  0x52   : > { %841 = vmatprep.subr.bf16.mxu0 %v1080_v6  ;;  %853 = vmatprep.subr.bf16.mxu1 %v1080_v6 }
  0x53   : > { %847 = vmatprep.mubr.msk.bf16.mxu0 %vm1081_vm1, %v1080_v6  ;;  %859 = vmatprep.mubr.msk.bf16.mxu1 %vm1081_vm1, %v1080_v6 }
  0x55   : > { %842 = vmatpush3.bf16.msra.mxu0 %v956_v7  ;;  %854 = vmatpush3.bf16.msra.mxu1 %v956_v7 }
  0x56   : > { %843 = vmatprep.subr.bf16.mxu0 %v1080_v6  ;;  %855 = vmatprep.subr.bf16.mxu1 %v1080_v6 }
  0x59   : > { %844 = vmatpush3.bf16.msra.mxu0 %v957_v8  ;;  %856 = vmatpush3.bf16.msra.mxu1 %v957_v8 }
  0x5a   : > { %845 = vmatprep.subr.bf16.mxu0 %v1080_v6  ;;  %857 = vmatprep.subr.bf16.mxu1 %v1080_v6 }
  0x5d   : > { %846 = vmatpush3.bf16.msra.mxu0 %v958_v9  ;;  %858 = vmatpush3.bf16.msra.mxu1 %v958_v9 }
  0x60   : > { %848 = vmatmul.mubr.msk.bf16.vlgmr.msra.gmra.mrb[4].mxu0 %vm356_vm2, %v780_v12  ;;  %860 = vmatmul.mubr.msk.bf16.vlgmr.msra.gmra.mrb[4].mxu1 %vm356_vm2, %v782_v13 }
 0x123   : > { %v394_v16 = vpop.f32.mrb[0].mxu0  ;;  %v444_v17 = vpop.f32.mrb[0].mxu1 }
 0x124   : > { %v400_v18 = vadd.f32 %v394_v16, %v330_v14  ;;  %v450_v19 = vadd.f32 %v444_v17, %v404_v15  ;;  %v825_v20 = vpop.f32.mrb[1].mxu0  ;;  %v837_v21 = vpop.f32.mrb[1].mxu1 }
 0x125   : > { %v397_v22 = vpop.f32.mrb[2].mxu0  ;;  %v447_v23 = vpop.f32.mrb[2].mxu1  ;;  %v786_v20 = vld [vmem:[%s1350_s3] ss:$0 sm:$0xff] (!%p784_p5) }
 0x126   : > { %402 = vst.msk [vmem:[#allocation2] sm:$0xf] %vm401_vm3, %v400_v18  ;;  %451 = vst.msk [vmem:[#allocation2 + $0x4] sm:$0xf] %vm401_vm3, %v450_v19  ;;  %v826_v24 = vpop.f32.mrb[3].mxu0  ;;  %v838_v25 = vpop.f32.mrb[3].mxu1 }
 0x127   : > { %v787_v22 = vld [vmem:[%s1351_s4] ss:$0 sm:$0xff] (!%p784_p5) }
 0x12d   : > { %v554_v38 = vld [vmem:[#allocation2] sm:$0xf] (!%p784_p5)  ;;  %v555_v43 = vld [vmem:[#allocation2 + $0x4] sm:$0xf] (!%p784_p5) }
 0x12e   : > { %v565_v41 = vadd.f32 (!%p784_p5), %v785_v39, %v554_v38  ;;  %v566_v45 = vadd.f32 (!%p784_p5), %v785_v39, %v555_v43 }
 0x130   : > { %553 = sbr.rel (%p784_p5) target bundleno = 640 (0x280), region = 89  ;;  %v569_v47 = vsel (!%p784_p5), %vm401_vm3, %v565_v41, 0.0  ;;  %v572_v49 = vsel (!%p784_p5), %vm401_vm3, %v566_v45, 0.0 }
 0x131   : > { %570 = vadd.xlane.f32.xlu0 (!%p784_p5), %v569_v47 }
 0x133   : > { %v493_v28 = vpop.f32.mrb[4].mxu0  ;;  %v542_v29 = vpop.f32.mrb[4].mxu1 }
 0x134   : > { %v499_v30 = vadd.f32 %v493_v28, %v453_v26  ;;  %v548_v31 = vadd.f32 %v542_v29, %v502_v27  ;;  %v849_v32 = vpop.f32.mrb[5].mxu0  ;;  %v861_v33 = vpop.f32.mrb[5].mxu1 }
 0x135   : > { %v496_v34 = vpop.f32.mrb[6].mxu0  ;;  %v545_v35 = vpop.f32.mrb[6].mxu1  ;;  %573 = vadd.xlane.f32.xlu0 (!%p784_p5), %v572_v49 }
 0x136   : > { %500 = vst.msk [vmem:[#allocation2 + $0x8] sm:$0xf] %vm401_vm3, %v499_v30  ;;  %549 = vst.msk [vmem:[#allocation2 + $0xc] sm:$0xf] %vm401_vm3, %v548_v31  ;;  %v850_v36 = vpop.f32.mrb[7].mxu0  ;;  %v862_v37 = vpop.f32.mrb[7].mxu1 }
 0x13d   : > { %v556_v40 = vld [vmem:[#allocation2 + $0x8] sm:$0xf]  ;;  %v557_v44 = vld [vmem:[#allocation2 + $0xc] sm:$0xf] }
 0x13e   : > { %v567_v42 = vadd.f32 %v785_v39, %v556_v40  ;;  %v568_v46 = vadd.f32 %v785_v39, %v557_v44 }
 0x140   : > { %v575_v48 = vsel %vm401_vm3, %v567_v42, 0.0  ;;  %v578_v50 = vsel %vm401_vm3, %v568_v46, 0.0 }
 0x141   : > { %576 = vadd.xlane.f32.xlu1 %v575_v48 }
 0x145   : > { %579 = vadd.xlane.f32.xlu1 %v578_v50 }
 0x1be   : > { %v571_v51 = vpop.xlane.xlu0 %570 }
 0x1bf   : > { %v582_v53 = vmul.f32 0.03125, %v571_v51 }
 0x1c1   : > { %v586_v55 = vsub.f32 %v565_v41, %v582_v53 }
 0x1c2   : > { %v574_v57 = vpop.xlane.xlu0 %573 }
 0x1c3   : > { %v583_v59 = vmul.f32 0.03125, %v574_v57  ;;  %v590_v61 = vmul.f32 %v586_v55, %v586_v55 }
 0x1c5   : > { %v587_v63 = vsub.f32 %v566_v45, %v583_v59  ;;  %v594_v1 = vsel %vm401_vm3, %v590_v61, 0.0 }
 0x1c6   : > { %595 = vadd.xlane.f32.xlu0 %v594_v1 }
 0x1c7   : > { %v591_v3 = vmul.f32 %v587_v63, %v587_v63 }
 0x1c9   : > { %v597_v5 = vsel %vm401_vm3, %v591_v3, 0.0 }
 0x1ca   : > { %598 = vadd.xlane.f32.xlu1 %v597_v5 }
 0x1ce   : > { %v577_v52 = vpop.xlane.xlu1 %576 }
 0x1cf   : > { %v584_v54 = vmul.f32 0.03125, %v577_v52 }
 0x1d1   : > { %v588_v56 = vsub.f32 %v567_v42, %v584_v54 }
 0x1d2   : > { %v580_v58 = vpop.xlane.xlu1 %579 }
 0x1d3   : > { %v585_v60 = vmul.f32 0.03125, %v580_v58  ;;  %v592_v62 = vmul.f32 %v588_v56, %v588_v56 }
 0x1d5   : > { %v589_v0 = vsub.f32 %v568_v46, %v585_v60  ;;  %v600_v2 = vsel %vm401_vm3, %v592_v62, 0.0 }
 0x1d6   : > { %601 = vadd.xlane.f32.xlu0 %v600_v2 }
 0x1d7   : > { %v593_v4 = vmul.f32 %v589_v0, %v589_v0 }
 0x1d9   : > { %v603_v6 = vsel %vm401_vm3, %v593_v4, 0.0 }
 0x1da   : > { %604 = vadd.xlane.f32.xlu1 %v603_v6 }
 0x253   : > { %v596_v7 = vpop.xlane.xlu0 %595 }
 0x254   : > { %v606_v8 = vmul.f32 0.03125, %v596_v7 }
 0x256   : > { %v610_v9 = vadd.f32 1e-05, %v606_v8 }
 0x257   : > { %v599_v10 = vpop.xlane.xlu1 %598 }
 0x258   : > { %959 = vrsqrt.f32 %v610_v9  ;;  %v607_v12 = vmul.f32 0.03125, %v599_v10 }
 0x25a   : > { %v611_v14 = vadd.f32 1e-05, %v607_v12 }
 0x25c   : > { %961 = vrsqrt.f32 %v611_v14 }
 0x262   : > { %v960_v19 = vpop.eup %959 }
 0x263   : > { %v602_v11 = vpop.xlane.xlu0 %601  ;;  %v618_v21 = vmul.f32 %v960_v19, %v586_v55 }
 0x264   : > { %v608_v13 = vmul.f32 0.03125, %v602_v11 }
 0x265   : > { %v629_v23 = vmul.f32 %v786_v20, %v618_v21 }
 0x266   : > { %v612_v15 = vadd.f32 1e-05, %v608_v13  ;;  %v962_v24 = vpop.eup %961 }
 0x267   : > { %v605_v16 = vpop.xlane.xlu1 %604  ;;  %v640_v26 = vadd.f32 %v787_v22, %v629_v23  ;;  %v619_v27 = vmul.f32 %v962_v24, %v587_v63 }
 0x268   : > { %v609_v17 = vmul.f32 0.03125, %v605_v16  ;;  %963 = vrsqrt.f32 %v612_v15 }
 0x269   : > { %v644_v29 = vpack.c.bf16 %v640_v26, %v640_v26  ;;  %v630_v30 = vmul.f32 %v786_v20, %v619_v27 }
 0x26a   : > { %v613_v18 = vadd.f32 1e-05, %v609_v17 }
 0x26b   : > { %649 = vst.msk [vmem:[%s1229_s0] sm:$0x3] %vm648_vm4, %v644_v29  ;;  %v641_v33 = vadd.f32 %v787_v22, %v630_v30 }
 0x26c   : > { %965 = vrsqrt.f32 %v613_v18 }
 0x26d   : > { %v645_v36 = vpack.c.bf16 %v641_v33, %v641_v33 }
 0x26f   : > { %650 = vst.msk [vmem:[%s1229_s0 + $0x2] sm:$0x3] %vm648_vm4, %v645_v36 }
 0x272   : > { %v964_v25 = vpop.eup %963 }
 0x273   : > { %v620_v28 = vmul.f32 %v964_v25, %v588_v56 }
 0x275   : > { %v631_v32 = vmul.f32 %v786_v20, %v620_v28 }
 0x276   : > { %v966_v31 = vpop.eup %965 }
 0x277   : > { %v621_v34 = vmul.f32 %v966_v31, %v589_v0  ;;  %v642_v35 = vadd.f32 %v787_v22, %v631_v32 }
 0x279   : > { %v632_v37 = vmul.f32 %v786_v20, %v621_v34  ;;  %v646_v38 = vpack.c.bf16 %v642_v35, %v642_v35 }
 0x27b   : > { %v643_v39 = vadd.f32 %v787_v22, %v632_v37  ;;  %651 = vst.msk [vmem:[%s1229_s0 + $0x4] sm:$0x3] %vm648_vm4, %v646_v38 }
 0x27d   : > { %v647_v40 = vpack.c.bf16 %v643_v39, %v643_v39 }
 0x27f   : > { %652 = vst.msk [vmem:[%s1229_s0 + $0x6] sm:$0x3] %vm648_vm4, %v647_v40 }
 0x280 PF: > { %s794_s8 = sshll.u32 %s1065_s24, 7  ;;  %s667_s7 = sshll.u32 %s1229_s0, 4  ;;  %s1285_s7 = int_to_ptr.vmem [resolvable:$true] %s667_s7 }
 0x281   : > { %s1282_s10 = scalar_lea.hbm %s1352_s5, %s794_s8  ;;  %s1289_s21 = scalar_lea.sflag [#allocation5], %s304_s9 }
 0x282   : > { %s967_s6 = scalar_lea.vmem %s1285_s7, 128  ;;  %s1082_s24 = smov [#allocation4]  }
 0x283   : > { %p968_p6 = scmp.ne.s32.totalorder %s1285_s7, %s967_s6  ;;  %s971_s23 = sshll.u32 %s1082_s24, 4  ;;  %s972_s23 = int_to_ptr.vmem [resolvable:$false] %s971_s23 }
 0x284   : > { %s973_s17 = scalar_lea.vmem %s972_s23, 256  ;;  %p974_p10 = scmp.lt.s32.totalorder %s1285_s7, %s972_s23 }
 0x285   : > { %p969_p8 = pnand %p968_p6, %p1187_p7  ;;  %p975_p11 = scmp.lt.s32.totalorder %s973_s17, %s967_s6 }
 0x287   : > { %p970_p9 = pneg %p969_p8  ;;  %p976_p13 = por %p975_p11, %p974_p10 }
 0x289   : > { %p977_p0 = pnand %p976_p13, %p970_p9 }
 0x28b   : > { %980 = shalt.err (!%p977_p0)
}
 0x28c   : > { %s981_s0 = scalar_lea.hbm %s1282_s10, 128  ;;  %s985_s29 = scalar_lea.hbm %s1352_s5, 256 }
 0x28d   : > { %p982_p1 = scmp.ne.s32.totalorder %s1282_s10, %s981_s0  ;;  %p986_p4 = scmp.lt.u32.totalorder %s1282_s10, %s1352_s5 }
 0x28e   : > { %p987_p5 = scmp.lt.u32.totalorder %s985_s29, %s981_s0  ;;  %p989_p8 = scmp.lt.u32.totalorder %s981_s0, %s1282_s10 }
 0x28f   : > { %p983_p2 = pnand %p982_p1, %p1187_p7 }
 0x290   : > { %p988_p6 = por %p987_p5, %p986_p4 }
 0x291   : > { %p984_p3 = pneg %p983_p2 }
 0x292   : > { %p990_p9 = por %p989_p8, %p988_p6 }
 0x294   : > { %p991_p10 = pnand %p990_p9, %p984_p3 }
 0x296   : > { %994 = shalt.err (!%p991_p10)
}
 0x297   : > { %s1083_s13 = smov 32   ;;  %s1084_s6 = smov 2  }
 0x298   : > { %863 = dma.vmem_to_hbm [thread:$0]  (%p1187_p7), %s1285_s7, 128, %s1282_s10, %s1289_s21, %s1083_s13, %s1083_s13, %s1084_s6  }
 0x299 PF: > { %p869_p11 = scmp.ge.s32.totalorder %s1077_s27, 2  ;;  %s682_s24 = sand.u32 1, %s1041_s18  }
 0x29a   : > { %s683_s23 = scalar_lea.sflag [#allocation5], %s682_s24 }
 0x29b   : > { %p866_p13 = pnand %p869_p11, %p1195_p12 }
 0x29d   : > { %1036 = dma.done.wait (!%p866_p13), %s683_s23, 128  }
 0x29e   : > { %1038 = vsyncadd (!%p866_p13), %s683_s23, 4294967168  ;;  %s18_s27 = sadd.s32 1, %s1077_s27   ;;  %s1360_s11 = sld [smem:[#allocation7_spill]] }
 0x29f   : > { %p15_p0 = scmp.ge.s32.totalorder %s18_s27, 6   ;;  %s1361_s18 = smov %s1045_s19 }
 0x2a0   : > { %s1362_s19 = smov %s1049_s20  ;;  %s1363_s20 = smov %s1200_s15 }
 0x2a1   : > { %s1364_s21 = smov %s1057_s22  ;;  %s1365_s22 = smov %s1203_s16 }
 0x2a2   : > { %s1366_s23 = smov %s1069_s25  ;;  %s1367_s24 = smov %s1073_s26 }
 0x2a3   : > { %s1368_s25 = smov %s1371_s30  ;;  %17 = sbr.rel (!%p15_p0) target bundleno = 8 (0x8), region = 138 }
 0x2a4   : > { %s1369_s26 = smov %s1360_s11 }
 0x2aa   :  { %688 = vsyncpa [#allocation5], 1 }
 0x2ab   :  { %690 = vsyncpa [#allocation5 + $0x1], 1 }

</bundles_post_ra>
